<compile_context>
chip_gen: v6e
topology: v6e:2x2x1
jax: 0.10.0
libtpu: 0.0.40
codegen_flags: <defaults>
</compile_context>

<pallas_src>
import jax
import jax.numpy as jnp
from jax.experimental import pallas as pl
from jax.experimental.pallas import tpu as pltpu


def _round_up(x, m):
    return ((x + m - 1) // m) * m


def _pick_batch_tile(B, block_b):
    """Batch tile: full-extent block if B is small, else a large sublane-
    aligned tile, preferring an even block count so both v7x TCs get work."""
    if B <= block_b:
        return B                                # single block == full dim (legal)
    tb = _round_up(block_b, 16)                 # sublane-friendly
    n = pl.cdiv(B, tb)
    if n > 1 and n % 2 == 1:
        tb = max(16, _round_up(pl.cdiv(B, n + 1), 128))   # even #blocks for v7x
    return tb


def ann_kernel(x_ref, w1_ref, b1_ref, w2_ref, b2_ref, out_ref):
    # fc1 + ReLU + fc2 fused; both matmuls on the MXU with f32 accumulation.
    x = x_ref[...]                                          # (TB, S) f32
    h = jnp.dot(x, w1_ref[...],
                preferred_element_type=jnp.float32)         # (TB, H) f32
    h = jnp.maximum(h + b1_ref[...], 0.0)                   # bias + ReLU (VPU)
    y = jnp.dot(h, w2_ref[...],
                preferred_element_type=jnp.float32)         # (TB, A) f32
    out_ref[...] = (y + b2_ref[...]).astype(out_ref.dtype)


def ann_forward(x, w1, b1, w2, b2, *, block_b=8192):
    """x: (B, S); w1: (S, 64); b1: (64,); w2: (64, A); b2: (A,). Returns (B, A) f32."""
    B, S = x.shape
    H = w1.shape[1]
    A = w2.shape[1]

    b1_2d = b1.reshape(1, H).astype(jnp.float32)            # tiny, negligible
    b2_2d = b2.reshape(1, A).astype(jnp.float32)

    tb = _pick_batch_tile(B, block_b)
    grid = (pl.cdiv(B, tb),)                                # ragged tail handled by Pallas

    flops = 2 * B * (S * H + H * A)
    bytes_accessed = (B * S * 4                              # x (f32, streamed)
                      + B * A * 4                            # out (f32)
                      + (S * H + H * A + H + A) * 4)         # resident params

    out = pl.pallas_call(
        ann_kernel,
        out_shape=jax.ShapeDtypeStruct((B, A), jnp.float32),
        grid_spec=pl.GridSpec(
            grid=grid,
            in_specs=[
                pl.BlockSpec((tb, S), lambda i: (i, 0)),     # x: streamed per tile
                pl.BlockSpec((S, H), lambda i: (0, 0)),      # w1: resident
                pl.BlockSpec((1, H), lambda i: (0, 0)),      # b1: resident
                pl.BlockSpec((H, A), lambda i: (0, 0)),      # w2: resident
                pl.BlockSpec((1, A), lambda i: (0, 0)),      # b2: resident
            ],
            out_specs=pl.BlockSpec((tb, A), lambda i: (i, 0)),
        ),
        compiler_params=pltpu.CompilerParams(
            dimension_semantics=("parallel",),               # megacore on v7x
            vmem_limit_bytes=32 * 1024 * 1024,               # headroom for big TB
        ),
        cost_estimate=pl.CostEstimate(
            flops=flops, transcendentals=0, bytes_accessed=bytes_accessed),
    )(x, w1, b1_2d, w2, b2_2d)

    return out


def init_params(key, state_size, action_size, hidden=64):
    """Deterministic init mirroring nn.Linear default (U[-1/sqrt(fan_in), ...])."""
    k1, k2, k3, k4 = jax.random.split(key, 4)
    bound1 = 1.0 / jnp.sqrt(state_size)
    bound2 = 1.0 / jnp.sqrt(hidden)
    # Stored already transposed: (in_features, out_features).
    w1 = jax.random.uniform(k1, (state_size, hidden), jnp.float32, -bound1, bound1)
    b1 = jax.random.uniform(k2, (hidden,), jnp.float32, -bound1, bound1)
    w2 = jax.random.uniform(k3, (hidden, action_size), jnp.float32, -bound2, bound2)
    b2 = jax.random.uniform(k4, (action_size,), jnp.float32, -bound2, bound2)
    return w1, b1, w2, b2


if __name__ == "__main__":
    batch = 200          # not a multiple of the tile -> exercises the ragged tail
    state_size = 32
    action_size = 8
    block_b = 64         # small demo tile -> grid of 4 pipelined steps

    key = jax.random.PRNGKey(0)
    k_x, k_p = jax.random.split(key)
    x = jax.random.normal(k_x, (batch, state_size), jnp.float32)
    w1, b1, w2, b2 = init_params(k_p, state_size, action_size)

    out = ann_forward(x, w1, b1, w2, b2, block_b=block_b)
    out = jax.block_until_ready(out)
    assert out.shape == (batch, action_size)

    # Pure-f32 PyTorch-equivalent forward (same semantics).
    ref = jnp.maximum(x @ w1 + b1, 0.0) @ w2 + b2
    assert jnp.allclose(out, ref, atol=2e-2, rtol=2e-2), \
        float(jnp.max(jnp.abs(out - ref)))

    print("KERNEL_OK")
</pallas_src>

<mosaic_0001>
module attributes {stable_mosaic.version = 11 : i64} {
  func.func @ann_kernel(%arg0: i32, %arg1: memref<64x32xf32, #tpu.memory_space<vmem>>, %arg2: memref<32x64xf32, #tpu.memory_space<vmem>>, %arg3: memref<1x64xf32, #tpu.memory_space<vmem>>, %arg4: memref<64x8xf32, #tpu.memory_space<vmem>>, %arg5: memref<1x8xf32, #tpu.memory_space<vmem>>, %arg6: memref<64x8xf32, #tpu.memory_space<vmem>>) attributes {dimension_semantics = [#tpu.dimension_semantics<parallel>], iteration_bounds = array<i64: 4>, scalar_prefetch = 0 : i64, scratch_operands = 0 : i64, tpu.core_type = #tpu.core_type<tc>, window_params = [{transform_indices = @transform_0, window_bounds = array<i64: 64, 32>}, {pipeline_mode = #tpu.pipeline_mode<synchronous>, transform_indices = @transform_1, window_bounds = array<i64: 32, 64>}, {pipeline_mode = #tpu.pipeline_mode<synchronous>, transform_indices = @transform_2, window_bounds = array<i64: 1, 64>}, {pipeline_mode = #tpu.pipeline_mode<synchronous>, transform_indices = @transform_3, window_bounds = array<i64: 64, 8>}, {pipeline_mode = #tpu.pipeline_mode<synchronous>, transform_indices = @transform_4, window_bounds = array<i64: 1, 8>}, {transform_indices = @transform_5, window_bounds = array<i64: 64, 8>}]} {
    %c0 = arith.constant 0 : index
    %c0_0 = arith.constant 0 : index
    %0 = vector.load %arg1[%c0, %c0_0] : memref<64x32xf32, #tpu.memory_space<vmem>>, vector<64x32xf32>
    %c0_1 = arith.constant 0 : index
    %c0_2 = arith.constant 0 : index
    %1 = vector.load %arg2[%c0_1, %c0_2] : memref<32x64xf32, #tpu.memory_space<vmem>>, vector<32x64xf32>
    %cst = arith.constant dense<0.000000e+00> : vector<64x64xf32>
    %2 = tpu.matmul %0, %1, %cst {dimension_numbers = #tpu.dot_dimension_numbers<[1], [0], [0], [1], [0, 0, 1, 1], [], []>} : vector<64x32xf32>, vector<32x64xf32>, vector<64x64xf32> -> vector<64x64xf32>
    %c0_3 = arith.constant 0 : index
    %c0_4 = arith.constant 0 : index
    %3 = vector.load %arg3[%c0_3, %c0_4] : memref<1x64xf32, #tpu.memory_space<vmem>>, vector<1x64xf32>
    %4 = vector.broadcast %3 : vector<1x64xf32> to vector<64x64xf32>
    %5 = arith.addf %2, %4 : vector<64x64xf32>
    %cst_5 = arith.constant 0.000000e+00 : f32
    %6 = vector.broadcast %cst_5 : f32 to vector<64x64xf32>
    %7 = arith.maximumf %5, %6 : vector<64x64xf32>
    %c0_6 = arith.constant 0 : index
    %c0_7 = arith.constant 0 : index
    %8 = vector.load %arg4[%c0_6, %c0_7] : memref<64x8xf32, #tpu.memory_space<vmem>>, vector<64x8xf32>
    %cst_8 = arith.constant dense<0.000000e+00> : vector<64x8xf32>
    %9 = tpu.matmul %7, %8, %cst_8 {dimension_numbers = #tpu.dot_dimension_numbers<[1], [0], [0], [1], [0, 0, 1, 1], [], []>} : vector<64x64xf32>, vector<64x8xf32>, vector<64x8xf32> -> vector<64x8xf32>
    %c0_9 = arith.constant 0 : index
    %c0_10 = arith.constant 0 : index
    %10 = vector.load %arg5[%c0_9, %c0_10] : memref<1x8xf32, #tpu.memory_space<vmem>>, vector<1x8xf32>
    %11 = vector.broadcast %10 : vector<1x8xf32> to vector<64x8xf32>
    %12 = arith.addf %9, %11 : vector<64x8xf32>
    %c0_11 = arith.constant 0 : index
    %c0_12 = arith.constant 0 : index
    %13 = vector.load %arg6[%c0_11, %c0_12] : memref<64x8xf32, #tpu.memory_space<vmem>>, vector<64x8xf32>
    tpu.vector_store %arg6[%c0_11, %c0_12], %12 {strides = array<i32>} : memref<64x8xf32, #tpu.memory_space<vmem>>, vector<64x8xf32>,
    return
  }
  func.func @transform_0(%arg0: i32) -> (i32, i32) {
    %c0_i32 = arith.constant 0 : i32
    %c0_i32_0 = arith.constant 0 : i32
    return %arg0, %c0_i32 : i32, i32
  }
  func.func @transform_1(%arg0: i32) -> (i32, i32) {
    %c0_i32 = arith.constant 0 : i32
    %c0_i32_0 = arith.constant 0 : i32
    %c0_i32_1 = arith.constant 0 : i32
    return %c0_i32, %c0_i32_0 : i32, i32
  }
  func.func @transform_2(%arg0: i32) -> (i32, i32) {
    %c0_i32 = arith.constant 0 : i32
    %c0_i32_0 = arith.constant 0 : i32
    %c0_i32_1 = arith.constant 0 : i32
    return %c0_i32, %c0_i32_0 : i32, i32
  }
  func.func @transform_3(%arg0: i32) -> (i32, i32) {
    %c0_i32 = arith.constant 0 : i32
    %c0_i32_0 = arith.constant 0 : i32
    %c0_i32_1 = arith.constant 0 : i32
    return %c0_i32, %c0_i32_0 : i32, i32
  }
  func.func @transform_4(%arg0: i32) -> (i32, i32) {
    %c0_i32 = arith.constant 0 : i32
    %c0_i32_0 = arith.constant 0 : i32
    %c0_i32_1 = arith.constant 0 : i32
    return %c0_i32, %c0_i32_0 : i32, i32
  }
  func.func @transform_5(%arg0: i32) -> (i32, i32) {
    %c0_i32 = arith.constant 0 : i32
    %c0_i32_0 = arith.constant 0 : i32
    return %arg0, %c0_i32 : i32, i32
  }
}

</mosaic_0001>

<bundles_post_ra>
// kernel: tpu_custom_call.1
= control target key start
LH: loop header
LB: loop body
LE: loop exit
PB: predicated region body
PF: predicated region fallthrough
CT: control target
= control target key end

     0   :  { %s1144_s18 = smov 0   ;;  %s1146_s19 = smov 0   ;;  %s1319_s0 = inlined_call_operand.vmem [shape: f32[200,32], index: 0, kind: input, shape index: {}]   ;;  %s1320_s1 = inlined_call_operand.vmem [shape: f32[32,64], index: 1, kind: input, shape index: {}]   ;;  %s1321_s2 = inlined_call_operand.vmem [shape: f32[1,64], index: 2, kind: input, shape index: {}]   ;;  %s1322_s3 = inlined_call_operand.vmem [shape: f32[64,8], index: 3, kind: input, shape index: {}]   ;;  %s1323_s4 = inlined_call_operand.vmem [shape: f32[1,8], index: 4, kind: input, shape index: {}]   ;;  %s1324_s5 = inlined_call_operand.vmem [shape: f32[200,8], index: 5, kind: output, shape index: {}]  }
   0x1   :  { %s1148_s20 = smov 0  }
   0x2 LB: > { %s1157_s21 = sadd.s32 4294967295, %s1080_s20   ;;  %s1159_s22 = sadd.s32 1, %s1080_s20   ;;  %s1080_s20 = sphi %s1148_s20, %s1331_s20   ;;  %s1076_s19 = sphi %s1146_s19, %s1330_s19   ;;  %s1072_s18 = sphi %s1144_s18, %s1329_s18  }
   0x3   : > { %s129_s23 = ssub.s32 %s1080_s20, %s1159_s22  ;;  %s132_s24 = sadd.s32 1, %s1076_s19 }
   0x4   : > { %p130_p0 = scmp.eq.s32.totalorder %s129_s23, 0  ;;  %p142_p1 = scmp.ne.s32.totalorder %s1076_s19, %s1072_s18 }
   0x5   : > { %p143_p2 = scmp.eq.s32.totalorder %s1157_s21, 3  ;;  %p804_p3 = scmp.ge.s32.totalorder %s1080_s20, 1 }
   0x6   : > { %s1167_s25 = scalar_select %p130_p0, %s1076_s19, %s132_s24  }
   0x7   : > { %p1169_p4 = por %p143_p2, %p142_p1  ;;  %p196_p5 = scmp.lt.s32.totalorder %s1080_s20, 5 }
   0x9   : > { %p197_p6 = pnand %p804_p3, %p196_p5 }
   0xa   : > { %s1180_s6 = sshll.u32 (!%p197_p6), %s1157_s21, 3 }
   0xb   : > { %200 = sbr.rel (%p197_p6) target bundleno = 474 (0x1da), region = 40  ;;  %p232_p7 = scmp.lt.s32.totalorder (!%p197_p6), %s1180_s6, 24 }
  0x10   : > { %v257_v0 = vld [vmem:[%s1320_s1 + $0x18] sm:$0xff]  ;;  %v256_v1 = vld [vmem:[%s1320_s1 + $0x10] sm:$0xff]  ;;  %v255_v3 = vld [vmem:[%s1320_s1 + $0x8] sm:$0xff]  ;;  %s233_s11 = scalar_select %p232_p7, %s1180_s6, 24  ;;  %vm265_vm0 = vcmask 261120   ;;  %vm418_vm1 = vcmask 523264  }
  0x11   : > { %874 = vmatprep.subr.mxu0 %v257_v0  ;;  %v410_v2 = vld [vmem:[%s1322_s3 + $0x38] sm:$0xff]  ;;  %v409_v4 = vld [vmem:[%s1322_s3 + $0x30] sm:$0xff]  ;;  %v254_v5 = vld [vmem:[%s1320_s1] sm:$0xff]  ;;  %vm548_vm2 = vcmask 64512  }
  0x12   : > { %875 = vmatpush3.msra.mxu0 %v257_v0  ;;  %922 = vmatprep.subr.mxu1 %v410_v2  ;;  %s807_s16 = sshll.u32 %s233_s11, 3  ;;  %v408_v6 = vld [vmem:[%s1322_s3 + $0x28] sm:$0xff]  ;;  %v407_v11 = vld [vmem:[%s1322_s3 + $0x20] sm:$0xff]  ;;  %v406_v16 = vld [vmem:[%s1322_s3 + $0x18] sm:$0xff] }
  0x13   : > { %876 = vmatprep.subr.mxu0 %v256_v1  ;;  %930 = vmatpush3.msra.mxu1 %v410_v2  ;;  %s235_s27 = scalar_lea.vmem %s1319_s0, %s807_s16  ;;  %v405_v17 = vld [vmem:[%s1322_s3 + $0x10] sm:$0xff]  ;;  %v404_v18 = vld [vmem:[%s1322_s3 + $0x8] sm:$0xff]  ;;  %v403_v19 = vld [vmem:[%s1322_s3] sm:$0xff]  ;;  %s224_s16 = sand.u32 1, %s1072_s18  }
  0x14   : > { %877 = vmatpush3.msra.mxu0 %v256_v1  ;;  %923 = vmatprep.subr.mxu1 %v409_v4  ;;  %v246_v7 = vld [vmem:[%s235_s27] sm:$0xff]  ;;  %v247_v8 = vld [vmem:[%s235_s27 + $0x8] sm:$0xff]  ;;  %v248_v9 = vld [vmem:[%s235_s27 + $0x10] sm:$0xff]  ;;  %s805_s17 = sshll.u32 %s224_s16, 6  ;;  %s565_s18 = ssub.s32 (%p1169_p4), 25, %s1180_s6 }
  0x15   : > { %878 = vmatprep.subr.mxu0 %v255_v3  ;;  %931 = vmatpush3.msra.mxu1 %v409_v4  ;;  %v249_v10 = vld [vmem:[%s235_s27 + $0x18] sm:$0xff]  ;;  %v250_v12 = vld [vmem:[%s235_s27 + $0x20] sm:$0xff]  ;;  %v251_v13 = vld [vmem:[%s235_s27 + $0x28] sm:$0xff]  ;;  %s1240_s24 = scalar_lea.vmem [#allocation2], %s805_s17   ;;  %p566_p8 = scmp.lt.s32.totalorder (%p1169_p4), %s565_s18, 8 }
  0x16   : > { %879 = vmatpush3.msra.mxu0 %v255_v3  ;;  %924 = vmatprep.subr.mxu1 %v408_v6  ;;  %v252_v14 = vld [vmem:[%s235_s27 + $0x30] sm:$0xff]  ;;  %v253_v15 = vld [vmem:[%s235_s27 + $0x38] sm:$0xff]  ;;  %v808_v20 = vld [vmem:[%s1321_s2] ss:$0 sm:$0xff]  ;;  %s843_s27 = sshll.u32 (%p1169_p4), %s1157_s21, 6 }
  0x17   : > { %880 = vmatprep.subr.mxu0 %v254_v5  ;;  %932 = vmatpush3.msra.mxu1 %v408_v6  ;;  %v817_v45 = vld [vmem:[%s1323_s4] ss:$0 sm:$0xff]  ;;  %s1265_s30 = scalar_lea.vmem (%p1169_p4), %s1324_s5, %s843_s27  }
  0x18   : > { %881 = vmatpush3.msra.mxu0 %v254_v5  ;;  %882 = vmatprep.mubr.msk.f32.mxu0 %vm265_vm0, %v246_v7 }
  0x19   : > { %883 = vmatmul.mubr.msk.f32.vlgmr.msra.gmra.mxu0 %vm265_vm0, %v247_v8  ;;  %894 = vmatprep.subr.mxu0 %v410_v2 }
  0x1a   : > { %885 = vmatprep.mubr.msk.f32.mxu0 %vm265_vm0, %v248_v9  ;;  %895 = vmatpush3.msra.mxu0 %v410_v2 }
  0x1b   : > { %896 = vmatprep.subr.mxu0 %v409_v4  ;;  %925 = vmatprep.subr.mxu1 %v407_v11 }
  0x1c   : > { %897 = vmatpush3.msra.mxu0 %v409_v4  ;;  %933 = vmatpush3.msra.mxu1 %v407_v11 }
  0x1d   : > { %886 = vmatmul.mubr.msk.f32.gmra.mxu0 %vm265_vm0, %v249_v10  ;;  %898 = vmatprep.subr.mxu0 %v408_v6 }
  0x1e   : > { %888 = vmatprep.mubr.msk.f32.mxu0 %vm265_vm0, %v250_v12  ;;  %899 = vmatpush3.msra.mxu0 %v408_v6 }
  0x1f   : > { %900 = vmatprep.subr.mxu0 %v407_v11  ;;  %926 = vmatprep.subr.mxu1 %v406_v16 }
  0x20   : > { %901 = vmatpush3.msra.mxu0 %v407_v11  ;;  %934 = vmatpush3.msra.mxu1 %v406_v16 }
  0x21   : > { %889 = vmatmul.mubr.msk.f32.gmra.mxu0 %vm265_vm0, %v251_v13  ;;  %902 = vmatprep.subr.mxu0 %v406_v16 }
  0x22   : > { %891 = vmatprep.mubr.msk.f32.mxu0 %vm265_vm0, %v252_v14  ;;  %903 = vmatpush3.msra.mxu0 %v406_v16 }
  0x23   : > { %904 = vmatprep.subr.mxu0 %v405_v17  ;;  %927 = vmatprep.subr.mxu1 %v405_v17 }
  0x24   : > { %905 = vmatpush3.msra.mxu0 %v405_v17  ;;  %935 = vmatpush3.msra.mxu1 %v405_v17 }
  0x25   : > { %892 = vmatmul.mubr.msk.f32.gmra.mxu0 %vm265_vm0, %v253_v15  ;;  %906 = vmatprep.subr.mxu0 %v404_v18 }
  0x26   : > { %928 = vmatprep.subr.mxu1 %v404_v18  ;;  %907 = vmatpush3.msra.mxu0 %v404_v18 }
  0x27   : > { %936 = vmatpush3.msra.mxu1 %v404_v18  ;;  %908 = vmatprep.subr.mxu0 %v403_v19 }
  0x28   : > { %929 = vmatprep.subr.mxu1 %v403_v19  ;;  %909 = vmatpush3.msra.mxu0 %v403_v19 }
  0x29   : > { %937 = vmatpush3.msra.mxu1 %v403_v19 }
  0xd9   : > { %v884_v21 = vpop.f32.mrf.mxu0 }
  0xda   : > { %v362_v22 = vadd.f32 %v884_v21, %v808_v20 }
  0xdb   : > { %v356_v23 = vpop.f32.mrf.mxu0 }
  0xdc   : > { %v357_v24 = vadd.f32 %v808_v20, %v356_v23  ;;  %v396_v27 = vmax.f32 %v362_v22, 0.0 }
  0xdd   : > { %v887_v25 = vpop.f32.mrf.mxu0 }
  0xde   : > { %v395_v26 = vmax.f32 %v357_v24, 0.0  ;;  %v372_v28 = vadd.f32 %v887_v25, %v808_v20 }
  0xdf   : > { %v366_v29 = vpop.f32.mrf.mxu0 }
  0xe0   : > { %v367_v30 = vadd.f32 %v808_v20, %v366_v29  ;;  %910 = vmatprep.mubr.msk.f32.mxu0 %vm418_vm1, %v395_v26  ;;  %v398_v33 = vmax.f32 %v372_v28, 0.0 }
  0xe1   : > { %v890_v31 = vpop.f32.mrf.mxu0  ;;  %911 = vmatmul.mubr.msk.f32.vlgmr.msra.gmra.mxu0 %vm418_vm1, %v396_v27 }
  0xe2   : > { %v397_v32 = vmax.f32 %v367_v30, 0.0  ;;  %v382_v34 = vadd.f32 %v890_v31, %v808_v20 }
  0xe3   : > { %v376_v35 = vpop.f32.mrf.mxu0 }
  0xe4   : > { %v377_v36 = vadd.f32 %v808_v20, %v376_v35  ;;  %913 = vmatprep.mubr.msk.f32.mxu1 %vm418_vm1, %v397_v32  ;;  %v400_v39 = vmax.f32 %v382_v34, 0.0 }
  0xe5   : > { %v893_v37 = vpop.f32.mrf.mxu0  ;;  %914 = vmatmul.mubr.msk.f32.vlgmr.msra.gmra.mxu1 %vm418_vm1, %v398_v33 }
  0xe6   : > { %v399_v38 = vmax.f32 %v377_v36, 0.0  ;;  %v392_v40 = vadd.f32 %v893_v37, %v808_v20 }
  0xe7   : > { %v386_v41 = vpop.f32.mrf.mxu0 }
  0xe8   : > { %v387_v42 = vadd.f32 %v808_v20, %v386_v41  ;;  %916 = vmatprep.mubr.msk.f32.mxu1 %vm418_vm1, %v399_v38  ;;  %v402_v44 = vmax.f32 %v392_v40, 0.0 }
  0xe9   : > { %917 = vmatmul.mubr.msk.f32.gmra.mxu1 %vm418_vm1, %v400_v39 }
  0xea   : > { %v401_v43 = vmax.f32 %v387_v42, 0.0 }
  0xec   : > { %919 = vmatprep.mubr.msk.f32.mxu1 %vm418_vm1, %v401_v43 }
  0xed   : > { %920 = vmatmul.mubr.msk.f32.gmra.mxu1 %vm418_vm1, %v402_v44 }
 0x1a1   : > { %v912_v46 = vpop.f32.mrf.mxu0 }
 0x1a2   : > { %v515_v47 = vadd.f32 %v912_v46, %v817_v45 }
 0x1a3   : > { %v509_v48 = vpop.f32.mrf.mxu0 }
 0x1a4   : > { %550 = vst.msk [vmem:[%s1240_s24 + $0x8] sm:$0xff] %vm548_vm2, %v515_v47  ;;  %v510_v49 = vadd.f32 %v817_v45, %v509_v48 }
 0x1a5   : > { %v915_v50 = vpop.f32.mrf.mxu1 }
 0x1a6   : > { %549 = vst.msk [vmem:[%s1240_s24] sm:$0xff] %vm548_vm2, %v510_v49  ;;  %v525_v51 = vadd.f32 %v915_v50, %v817_v45 }
 0x1a7   : > { %v519_v52 = vpop.f32.mrf.mxu1 }
 0x1a8   : > { %552 = vst.msk [vmem:[%s1240_s24 + $0x18] sm:$0xff] %vm548_vm2, %v525_v51  ;;  %v520_v53 = vadd.f32 %v817_v45, %v519_v52 }
 0x1a9   : > { %v918_v54 = vpop.f32.mrf.mxu1 }
 0x1aa   : > { %551 = vst.msk [vmem:[%s1240_s24 + $0x10] sm:$0xff] %vm548_vm2, %v520_v53  ;;  %v535_v55 = vadd.f32 %v918_v54, %v817_v45 }
 0x1ab   : > { %v529_v56 = vpop.f32.mrf.mxu1 }
 0x1ac   : > { %554 = vst.msk [vmem:[%s1240_s24 + $0x28] sm:$0xff] %vm548_vm2, %v535_v55  ;;  %v530_v57 = vadd.f32 %v817_v45, %v529_v56 }
 0x1ad   : > { %v921_v58 = vpop.f32.mrf.mxu1 }
 0x1ae   : > { %553 = vst.msk [vmem:[%s1240_s24 + $0x20] sm:$0xff] %vm548_vm2, %v530_v57  ;;  %v545_v59 = vadd.f32 %v921_v58, %v817_v45  ;;  %563 = sbr.rel (!%p1169_p4) target bundleno = 474 (0x1da), region = 44 }
 0x1af   : > { %v539_v60 = vpop.f32.mrf.mxu1 }
 0x1b0   : > { %556 = vst.msk [vmem:[%s1240_s24 + $0x38] sm:$0xff] %vm548_vm2, %v545_v59  ;;  %v540_v61 = vadd.f32 %v817_v45, %v539_v60 }
 0x1b2   : > { %555 = vst.msk [vmem:[%s1240_s24 + $0x30] sm:$0xff] %vm548_vm2, %v540_v61 }
 0x1b3   : > { %s1333_s18 = smov (!%p566_p8, %s565_s18), 8 }
 0x1b4   : > { %s828_s7 = sshll.u32 %s1333_s18, 7 }
 0x1b5   : > { %p831_p9 = scmp.eq.s32.totalorder %s828_s7, 0 }
 0x1b6   : > { %s1271_s8 = sshrl.u32 (!%p831_p9), %s1333_s18, 3 }
 0x1b7   : > { %574 = sbr.rel (%p831_p9) target bundleno = 474 (0x1da), region = 48  ;;  %p832_p10 = scmp.le.s32.totalorder (!%p831_p9), %s1271_s8, 0 }
 0x1bc   : > { %757 = sbr.rel (%p832_p10) target bundleno = 457 (0x1c9), region = 124  ;;  %s1326_s21 = smov (!%p832_p10), %s1265_s30 }
 0x1bd   : > { %s1327_s26 = smov (!%p832_p10), %s1240_s24  ;;  %s1280_s6 = smov (!%p832_p10), 0  }
 0x1be   : > { %s1282_s9 = smov (!%p832_p10), 0  }
 0x1c1 LB: >> { %v651_v62 = vld [vmem:[%s1088_s26] sm:$0xff]  ;;  %v653_v63 = vld [vmem:[%s1088_s26 + $0x8] sm:$0xff]  ;;  %v655_v0 = vld [vmem:[%s1088_s26 + $0x10] sm:$0xff]  ;;  %s667_s10 = sadd.s32 1, %s1092_s6  ;;  %s645_s9 = sadd.s32 1, %s1096_s9   ;;  %s1096_s9 = sphi %s1282_s9, %s645_s9   ;;  %s1092_s6 = sphi %s1280_s6, %s1328_s6   ;;  %s1088_s26 = sphi %s1327_s26, %s672_s26   ;;  %s1084_s21 = sphi %s1326_s21, %s673_s21  }
 0x1c2   : >> { %652 = vst [vmem:[%s1084_s21] sm:$0xff] %v651_v62  ;;  %654 = vst [vmem:[%s1084_s21 + $0x8] sm:$0xff] %v653_v63  ;;  %v657_v1 = vld [vmem:[%s1088_s26 + $0x18] sm:$0xff]  ;;  %v659_v2 = vld [vmem:[%s1088_s26 + $0x20] sm:$0xff]  ;;  %p668_p11 = scmp.ge.s32.totalorder %s667_s10, %s1271_s8  ;;  %p644_p12 = scmp.ge.s32.totalorder %s645_s9, %s1271_s8 }
 0x1c3   : >> { %656 = vst [vmem:[%s1084_s21 + $0x10] sm:$0xff] %v655_v0  ;;  %v661_v3 = vld [vmem:[%s1088_s26 + $0x28] sm:$0xff]  ;;  %658 = vst [vmem:[%s1084_s21 + $0x18] sm:$0xff] %v657_v1  ;;  %v663_v4 = vld [vmem:[%s1088_s26 + $0x30] sm:$0xff] }
 0x1c4   : >> { %660 = vst [vmem:[%s1084_s21 + $0x20] sm:$0xff] %v659_v2  ;;  %662 = vst [vmem:[%s1084_s21 + $0x28] sm:$0xff] %v661_v3  ;;  %v665_v5 = vld [vmem:[%s1088_s26 + $0x38] sm:$0xff]  ;;  %s1335_s10 = smov (%p668_p11, %s667_s10), 0  ;;  %647 = sbr.rel (!%p644_p12) target bundleno = 449 (0x1c1), region = 130 }
 0x1c5   : >> { %664 = vst [vmem:[%s1084_s21 + $0x30] sm:$0xff] %v663_v4  ;;  %666 = vst [vmem:[%s1084_s21 + $0x38] sm:$0xff] %v665_v5  ;;  %s833_s11 = sshll.u32 %s1335_s10, 6  ;;  %s1328_s6 = smov %s1335_s10 }
 0x1c6   : >> { %s672_s26 = scalar_lea.vmem %s1240_s24, %s833_s11 [#allocation2]   ;;  %s673_s21 = scalar_lea.vmem %s1265_s30, %s833_s11  }
 0x1c9 PF: > { %s1301_s12 = sand.u32 7, %s1333_s18   ;;  %s844_s13 = sshll.u32 %s1271_s8, 6 }
 0x1ca   : > { %s678_s14 = scalar_lea.vmem %s1240_s24, %s844_s13 [#allocation2]   ;;  %s680_s15 = scalar_lea.vmem %s1265_s30, %s844_s13  }
 0x1cb   : > { %p838_p13 = scmp.le.s32.totalorder %s1301_s12, 0 }
 0x1cc   : > { %s1098_s16 = smov (!%p838_p13), %s680_s15   ;;  %s1102_s17 = smov (!%p838_p13), %s678_s14  }
 0x1cd   : > { %771 = sbr.rel (%p838_p13) target bundleno = 474 (0x1da), region = 135  ;;  %s1106_s20 = smov (!%p838_p13), 0  }
 0x1ce   : > { %s1110_s23 = smov (!%p838_p13), 0  }
 0x1d2 LB: >> { %v690_v6 = vld [vmem:[%s1104_s17] sm:$0xff]  ;;  %s692_s18 = sadd.s32 1, %s1108_s20  ;;  %s684_s23 = sadd.s32 1, %s1112_s23   ;;  %s1112_s23 = sphi %s1110_s23, %s684_s23   ;;  %s1108_s20 = sphi %s1106_s20, %s1107_s20   ;;  %s1104_s17 = sphi %s1102_s17, %s697_s17   ;;  %s1100_s16 = sphi %s1098_s16, %s698_s16  }
 0x1d3   : >> { %691 = vst [vmem:[%s1100_s16] sm:$0xff] %v690_v6  ;;  %p693_p0 = scmp.ge.s32.totalorder %s692_s18, %s1301_s12  ;;  %p683_p1 = scmp.ge.s32.totalorder %s684_s23, %s1301_s12 }
 0x1d5   : >> { %s1337_s18 = smov (%p693_p0, %s692_s18), 0  ;;  %686 = sbr.rel (!%p683_p1) target bundleno = 466 (0x1d2), region = 141 }
 0x1d6   : >> { %s839_s24 = sshll.u32 %s1337_s18, 3  ;;  %s1107_s20 = smov %s1337_s18  }
 0x1d7   : >> { %s697_s17 = scalar_lea.vmem %s678_s14, %s839_s24 [#allocation2]   ;;  %s698_s16 = scalar_lea.vmem %s680_s15, %s839_s24  }
 0x1da PF: > { %p12_p2 = scmp.ge.s32.totalorder %s1159_s22, 6   ;;  %s1329_s18 = smov %s1076_s19 }
 0x1db   : > { %s1330_s19 = smov %s1167_s25  ;;  %s1331_s20 = smov %s1159_s22 }
 0x1dc   :  { %14 = sbr.rel (!%p12_p2) target bundleno = 2 (0x2), region = 152 }

</bundles_post_ra>
